<compile_context>
chip_gen: v7x
topology: tpu7x:2x2x1
jax: 0.10.0
libtpu: 0.0.40
codegen_flags: <defaults>
</compile_context>

<pallas_src>
import jax
import jax.numpy as jnp
from jax.experimental import pallas as pl
from jax.experimental.pallas import tpu as pltpu

EPS = 1e-5


def _round_up(x, m):
    return (x + m - 1) // m * m


# ---------------------------------------------------------------------------
# Pass 1: class histogram over all rows + (classes, out_dim) output table.
# ---------------------------------------------------------------------------
def _table_kernel(idxT_ref, w1_ref, b1_ref, g1_ref, be1_ref,
                  w2_ref, b2_ref, g2_ref, be2_ref, slopes_ref,
                  table_ref, cnt_ref):
    fold, tile_r = idxT_ref.shape
    classes = w1_ref.shape[0]
    step = pl.program_id(0)

    @pl.when(step == 0)
    def _init():
        cnt_ref[...] = jnp.zeros_like(cnt_ref)

    # Histogram of this tile.  Padded rows hold an out-of-range sentinel and
    # therefore never match any class.  classes sit on sublanes, rows on the
    # 128-wide lane axis (dense compare + lane reduce on the XLU).
    class_iota = jax.lax.broadcasted_iota(jnp.int32, (classes, tile_r), 0)
    hits = jnp.zeros((classes, tile_r), jnp.float32)
    for j in range(fold):
        hits += (class_iota == idxT_ref[j:j + 1, :]).astype(jnp.float32)
    cnt_ref[...] += jnp.sum(hits, axis=1, keepdims=True)          # (classes, 1)

    # On the last tile, build the output table with histogram-weighted
    # (exact, centered) train-mode batch statistics.
    @pl.when(step == pl.num_programs(0) - 1)
    def _finalize():
        cnt = cnt_ref[...]                          # (classes, 1)
        inv_n = 1.0 / jnp.sum(cnt)                  # 1 / real batch size N
        a1 = slopes_ref[0]
        a2 = slopes_ref[1]

        # Layer 1: the one-hot matmul is just a row copy of W1 (+ bias).
        h = w1_ref[...] + b1_ref[...]                               # (classes, hid1)
        mean1 = jnp.sum(h * cnt, axis=0, keepdims=True) * inv_n     # (1, hid1)
        d = h - mean1
        var1 = jnp.sum(d * d * cnt, axis=0, keepdims=True) * inv_n
        scale1 = jax.lax.rsqrt(var1 + EPS) * g1_ref[...]            # gamma folded in
        z = d * scale1 + be1_ref[...]
        z = jnp.where(z > 0, z, a1 * z)                             # PReLU

        # Layer 2.
        y = jnp.dot(z, w2_ref[...],
                    preferred_element_type=jnp.float32) + b2_ref[...]
        mean2 = jnp.sum(y * cnt, axis=0, keepdims=True) * inv_n
        e = y - mean2
        var2 = jnp.sum(e * e * cnt, axis=0, keepdims=True) * inv_n
        scale2 = jax.lax.rsqrt(var2 + EPS) * g2_ref[...]
        t = e * scale2 + be2_ref[...]
        table_ref[...] = jnp.where(t > 0, t, a2 * t).astype(table_ref.dtype)


# ---------------------------------------------------------------------------
# Pass 2: per-row lookup of the output table, written 128-lane-dense
# (fold = 128 // out_dim consecutive rows packed per vreg row).
# ---------------------------------------------------------------------------
def _lookup_kernel(idx_ref, tbd_ref, o_ref):
    tile_r, fold = idx_ref.shape
    lanes = tbd_ref.shape[0]              # fold * classes
    classes = lanes // fold
    lane_iota = jax.lax.broadcasted_iota(jnp.int32, (tile_r, lanes), 1)
    onehot = jnp.zeros((tile_r, lanes), jnp.float32)
    for j in range(fold):
        onehot += (lane_iota == idx_ref[:, j:j + 1] + j * classes
                   ).astype(jnp.float32)
    # Gather == one-hot @ block-diag(table); the output tile is the row-major
    # (fold*tile_r, out_dim) slab stored with dense 128-wide lanes.
    o_ref[...] = jnp.dot(onehot, tbd_ref[...],
                         preferred_element_type=jnp.float32).astype(o_ref.dtype)


# ---------------------------------------------------------------------------
# Wrappers
# ---------------------------------------------------------------------------
def pos_encoder_apply_indices(idx, params, *, tile_rows=512):
    """idx: (N,) int32 class ids in [0, classes). Returns (N, out_dim) f32."""
    w1, b1, g1, be1, a1, w2, b2, g2, be2, a2 = params
    classes, hid1 = w1.shape
    out_dim = w2.shape[1]
    n = idx.shape[0]

    # Fold `fold` consecutive rows into one 128-lane row so output stores are
    # unmasked and lane-dense.
    fold = 128 // out_dim if (out_dim <= 128 and 128 % out_dim == 0) else 1
    r = -(-n // fold)
    tile_r = tile_rows if r >= tile_rows else _round_up(r, 8)
    r_pad = _round_up(r, tile_r)
    num_tiles = r_pad // tile_r

    sentinel = fold * classes             # never matches any lane / class
    idx_pad = jnp.concatenate(
        [idx.astype(jnp.int32),
         jnp.full((r_pad * fold - n,), sentinel, dtype=jnp.int32)])
    idx_f = idx_pad.reshape(r_pad, fold)          # row-major fold layout
    idx_t = idx_f.T                               # (fold, r_pad) for the stats pass

    slopes = jnp.concatenate([a1.reshape(-1), a2.reshape(-1)]).astype(jnp.float32)

    const = lambda shape: pl.BlockSpec(shape, lambda i, s=len(shape): (0,) * s)

    # ---- pass 1: histogram + output table ----
    table = pl.pallas_call(
        _table_kernel,
        out_shape=jax.ShapeDtypeStruct((classes, out_dim), jnp.float32),
        grid=(num_tiles,),
        in_specs=[
            pl.BlockSpec((fold, tile_r), lambda i: (0, i)),
            const((classes, hid1)),
            const((1, hid1)), const((1, hid1)), const((1, hid1)),
            const((hid1, out_dim)),
            const((1, out_dim)), const((1, out_dim)), const((1, out_dim)),
            pl.BlockSpec(memory_space=pltpu.MemorySpace.SMEM),   # PReLU slopes
        ],
        out_specs=const((classes, out_dim)),
        scratch_shapes=[pltpu.VMEM((classes, 1), jnp.float32)],
        compiler_params=pltpu.CompilerParams(
            dimension_semantics=("arbitrary",)),
    )(idx_t, w1, b1, g1, be1, w2, b2, g2, be2, slopes)

    # Block-diagonal copy of the table so the folded lookup is a single dot.
    table_bd = jnp.kron(jnp.eye(fold, dtype=table.dtype), table)

    # ---- pass 2: lane-dense lookup, parallel over N tiles (2 TCs on v7x) ----
    out_folded = pl.pallas_call(
        _lookup_kernel,
        out_shape=jax.ShapeDtypeStruct((r_pad, fold * out_dim), jnp.float32),
        grid=(num_tiles,),
        in_specs=[
            pl.BlockSpec((tile_r, fold), lambda i: (i, 0)),
            const((fold * classes, fold * out_dim)),
        ],
        out_specs=pl.BlockSpec((tile_r, fold * out_dim), lambda i: (i, 0)),
        compiler_params=pltpu.CompilerParams(
            dimension_semantics=("parallel",)),
    )(idx_f, table_bd)

    return out_folded.reshape(r_pad * fold, out_dim)[:n]


@jax.jit
def pos_encoder_forward(pos_onehot, params):
    """pos_onehot: (B, L, classes) one-hot float32 -> (B, L, out_dim) float32."""
    b, l, _ = pos_onehot.shape
    idx = jnp.argmax(pos_onehot, axis=-1).astype(jnp.int32).reshape(-1)
    out = pos_encoder_apply_indices(idx, params)
    return out.reshape(b, l, -1)


def init_params(key, classes, hid1_dim, out_dim):
    """Deterministic synthetic parameters matching the PyTorch module's shapes."""
    k1, k2, k3, k4 = jax.random.split(key, 4)
    # Linear weights stored already transposed to (in, out).
    w1 = jax.random.normal(k1, (classes, hid1_dim), jnp.float32) * 0.1
    b1 = jax.random.normal(k2, (1, hid1_dim), jnp.float32) * 0.01
    w2 = jax.random.normal(k3, (hid1_dim, out_dim), jnp.float32) * 0.1
    b2 = jax.random.normal(k4, (1, out_dim), jnp.float32) * 0.01
    g1 = jnp.ones((1, hid1_dim), jnp.float32)
    be1 = jnp.zeros((1, hid1_dim), jnp.float32)
    g2 = jnp.ones((1, out_dim), jnp.float32)
    be2 = jnp.zeros((1, out_dim), jnp.float32)
    a1 = jnp.full((1, 1), 0.25, jnp.float32)      # PReLU default slope
    a2 = jnp.full((1, 1), 0.25, jnp.float32)
    return (w1, b1, g1, be1, a1, w2, b2, g2, be2, a2)


def _reference(pos_onehot, params):
    """Pure-JAX reference of the same forward semantics (train-mode BN)."""
    w1, b1, g1, be1, a1, w2, b2, g2, be2, a2 = params
    b, l, c = pos_onehot.shape
    x = pos_onehot.reshape(-1, c)

    def block(x, w, bias, g, be, a):
        h = jnp.dot(x, w, precision=jax.lax.Precision.HIGHEST) + bias
        m = h.mean(0, keepdims=True)
        v = ((h - m) ** 2).mean(0, keepdims=True)
        hn = (h - m) / jnp.sqrt(v + EPS) * g + be
        return jnp.where(hn > 0, hn, a[0, 0] * hn)

    y = block(block(x, w1, b1, g1, be1, a1), w2, b2, g2, be2, a2)
    return y.reshape(b, l, -1)


if __name__ == "__main__":
    B, L = 2, 8
    CLASSES, HID1, OUT = 16, 32, 32

    key = jax.random.PRNGKey(0)
    kx, kp = jax.random.split(key)
    pos_onehot = jax.nn.one_hot(
        jax.random.randint(kx, (B, L), 0, CLASSES), CLASSES, dtype=jnp.float32)
    params = init_params(kp, CLASSES, HID1, OUT)

    out = jax.block_until_ready(pos_encoder_forward(pos_onehot, params))
    ref = _reference(pos_onehot, params)
    assert out.shape == (B, L, OUT)
    assert jnp.allclose(out, ref, atol=2e-4, rtol=2e-4), \
        float(jnp.max(jnp.abs(out - ref)))

    # Larger check exercising the multi-tile (grid > 1) pipelined path.
    B2, L2 = 8, 1024
    pos2 = jax.nn.one_hot(
        jax.random.randint(jax.random.PRNGKey(1), (B2, L2), 0, CLASSES),
        CLASSES, dtype=jnp.float32)
    out2 = jax.block_until_ready(pos_encoder_forward(pos2, params))
    ref2 = _reference(pos2, params)
    assert jnp.allclose(out2, ref2, atol=2e-4, rtol=2e-4), \
        float(jnp.max(jnp.abs(out2 - ref2)))

    print("KERNEL_OK")
</pallas_src>

<mosaic_0001>
module attributes {stable_mosaic.version = 11 : i64} {
  func.func @_table_kernel(%arg0: i32, %arg1: memref<4x8xi32, #tpu.memory_space<vmem>>, %arg2: memref<16x32xf32, #tpu.memory_space<vmem>>, %arg3: memref<1x32xf32, #tpu.memory_space<vmem>>, %arg4: memref<1x32xf32, #tpu.memory_space<vmem>>, %arg5: memref<1x32xf32, #tpu.memory_space<vmem>>, %arg6: memref<32x32xf32, #tpu.memory_space<vmem>>, %arg7: memref<1x32xf32, #tpu.memory_space<vmem>>, %arg8: memref<1x32xf32, #tpu.memory_space<vmem>>, %arg9: memref<1x32xf32, #tpu.memory_space<vmem>>, %arg10: memref<2xf32, #tpu.memory_space<smem>>, %arg11: memref<16x32xf32, #tpu.memory_space<vmem>>, %arg12: memref<16x1xf32, #tpu.memory_space<vmem>>) attributes {dimension_semantics = [#tpu.dimension_semantics<arbitrary>], iteration_bounds = array<i64: 1>, scalar_prefetch = 0 : i64, scratch_operands = 1 : i64, tpu.core_type = #tpu.core_type<tc>, window_params = [{transform_indices = @transform_0, window_bounds = array<i64: 4, 8>}, {pipeline_mode = #tpu.pipeline_mode<synchronous>, transform_indices = @transform_1, window_bounds = array<i64: 16, 32>}, {pipeline_mode = #tpu.pipeline_mode<synchronous>, transform_indices = @transform_2, window_bounds = array<i64: 1, 32>}, {pipeline_mode = #tpu.pipeline_mode<synchronous>, transform_indices = @transform_3, window_bounds = array<i64: 1, 32>}, {pipeline_mode = #tpu.pipeline_mode<synchronous>, transform_indices = @transform_4, window_bounds = array<i64: 1, 32>}, {pipeline_mode = #tpu.pipeline_mode<synchronous>, transform_indices = @transform_5, window_bounds = array<i64: 32, 32>}, {pipeline_mode = #tpu.pipeline_mode<synchronous>, transform_indices = @transform_6, window_bounds = array<i64: 1, 32>}, {pipeline_mode = #tpu.pipeline_mode<synchronous>, transform_indices = @transform_7, window_bounds = array<i64: 1, 32>}, {pipeline_mode = #tpu.pipeline_mode<synchronous>, transform_indices = @transform_8, window_bounds = array<i64: 1, 32>}, {transform_indices = @transform_9, window_bounds = array<i64: 2>}, {pipeline_mode = #tpu.pipeline_mode<synchronous>, transform_indices = @transform_10, window_bounds = array<i64: 16, 32>}]} {
    %c0_i32 = arith.constant 0 : i32
    %0 = arith.cmpi eq, %arg0, %c0_i32 : i32
    %1 = arith.extui %0 : i1 to i32
    %c0_i32_0 = arith.constant 0 : i32
    %2 = arith.cmpi ne, %1, %c0_i32_0 : i32
    scf.if %2 {
      %cst_12 = arith.constant 0.000000e+00 : f32
      %37 = vector.broadcast %cst_12 : f32 to vector<16x1xf32>
      %c0_13 = arith.constant 0 : index
      %c0_14 = arith.constant 0 : index
      %38 = vector.load %arg12[%c0_13, %c0_14] : memref<16x1xf32, #tpu.memory_space<vmem>>, vector<16x1xf32>
      tpu.vector_store %arg12[%c0_13, %c0_14], %37 {strides = array<i32>} : memref<16x1xf32, #tpu.memory_space<vmem>>, vector<16x1xf32>,
    } else {
    }
    %3 = tpu.iota {dimensions = array<i32: 0>} : vector<16x8xi32>
    %cst = arith.constant 0.000000e+00 : f32
    %4 = vector.broadcast %cst : f32 to vector<16x8xf32>
    %c0 = arith.constant 0 : index
    %c0_1 = arith.constant 0 : index
    %5 = vector.load %arg1[%c0, %c0_1] : memref<4x8xi32, #tpu.memory_space<vmem>>, vector<1x8xi32>
    %6 = vector.broadcast %5 : vector<1x8xi32> to vector<16x8xi32>
    %7 = arith.cmpi eq, %3, %6 : vector<16x8xi32>
    %8 = arith.extui %7 : vector<16x8xi1> to vector<16x8xi32>
    %9 = arith.sitofp %8 : vector<16x8xi32> to vector<16x8xf32>
    %10 = arith.addf %4, %9 : vector<16x8xf32>
    %c1 = arith.constant 1 : index
    %c0_2 = arith.constant 0 : index
    %11 = vector.load %arg1[%c1, %c0_2] : memref<4x8xi32, #tpu.memory_space<vmem>>, vector<1x8xi32>
    %12 = vector.broadcast %11 : vector<1x8xi32> to vector<16x8xi32>
    %13 = arith.cmpi eq, %3, %12 : vector<16x8xi32>
    %14 = arith.extui %13 : vector<16x8xi1> to vector<16x8xi32>
    %15 = arith.sitofp %14 : vector<16x8xi32> to vector<16x8xf32>
    %16 = arith.addf %10, %15 : vector<16x8xf32>
    %c2 = arith.constant 2 : index
    %c0_3 = arith.constant 0 : index
    %17 = vector.load %arg1[%c2, %c0_3] : memref<4x8xi32, #tpu.memory_space<vmem>>, vector<1x8xi32>
    %18 = vector.broadcast %17 : vector<1x8xi32> to vector<16x8xi32>
    %19 = arith.cmpi eq, %3, %18 : vector<16x8xi32>
    %20 = arith.extui %19 : vector<16x8xi1> to vector<16x8xi32>
    %21 = arith.sitofp %20 : vector<16x8xi32> to vector<16x8xf32>
    %22 = arith.addf %16, %21 : vector<16x8xf32>
    %c3 = arith.constant 3 : index
    %c0_4 = arith.constant 0 : index
    %23 = vector.load %arg1[%c3, %c0_4] : memref<4x8xi32, #tpu.memory_space<vmem>>, vector<1x8xi32>
    %24 = vector.broadcast %23 : vector<1x8xi32> to vector<16x8xi32>
    %25 = arith.cmpi eq, %3, %24 : vector<16x8xi32>
    %26 = arith.extui %25 : vector<16x8xi1> to vector<16x8xi32>
    %27 = arith.sitofp %26 : vector<16x8xi32> to vector<16x8xf32>
    %28 = arith.addf %22, %27 : vector<16x8xf32>
    %c0_5 = arith.constant 0 : index
    %c0_6 = arith.constant 0 : index
    %29 = vector.load %arg12[%c0_5, %c0_6] : memref<16x1xf32, #tpu.memory_space<vmem>>, vector<16x1xf32>
    %cst_7 = arith.constant dense<0.000000e+00> : vector<16xf32>
    %30 = vector.multi_reduction <add>, %28, %cst_7 [1] : vector<16x8xf32> to vector<16xf32>
    %31 = vector.shape_cast %30 : vector<16xf32> to vector<16x1xf32>
    %32 = arith.addf %29, %31 : vector<16x1xf32>
    %c0_8 = arith.constant 0 : index
    %c0_9 = arith.constant 0 : index
    %33 = vector.load %arg12[%c0_8, %c0_9] : memref<16x1xf32, #tpu.memory_space<vmem>>, vector<16x1xf32>
    tpu.vector_store %arg12[%c0_8, %c0_9], %32 {strides = array<i32>} : memref<16x1xf32, #tpu.memory_space<vmem>>, vector<16x1xf32>,
    %c0_i32_10 = arith.constant 0 : i32
    %34 = arith.cmpi eq, %arg0, %c0_i32_10 : i32
    %35 = arith.extui %34 : i1 to i32
    %c0_i32_11 = arith.constant 0 : i32
    %36 = arith.cmpi ne, %35, %c0_i32_11 : i32
    scf.if %36 {
      %c0_12 = arith.constant 0 : index
      %c0_13 = arith.constant 0 : index
      %37 = vector.load %arg12[%c0_12, %c0_13] : memref<16x1xf32, #tpu.memory_space<vmem>>, vector<16x1xf32>
      %38 = vector.shape_cast %37 : vector<16x1xf32> to vector<1x16x1xf32>
      %cst_14 = arith.constant dense<0.000000e+00> : vector<1xf32>
      %39 = vector.multi_reduction <add>, %38, %cst_14 [1, 2] : vector<1x16x1xf32> to vector<1xf32>
      %40 = vector.shape_cast %39 : vector<1xf32> to vector<1x1x1xf32>
      %41 = vector.extract %40[0, 0, 0] : f32 from vector<1x1x1xf32>
      %cst_15 = arith.constant 1.000000e+00 : f32
      %42 = arith.divf %cst_15, %41 : f32
      %c0_16 = arith.constant 0 : index
      %43 = memref.load %arg10[%c0_16] : memref<2xf32, #tpu.memory_space<smem>>
      %c1_17 = arith.constant 1 : index
      %44 = memref.load %arg10[%c1_17] : memref<2xf32, #tpu.memory_space<smem>>
      %c0_18 = arith.constant 0 : index
      %c0_19 = arith.constant 0 : index
      %45 = vector.load %arg2[%c0_18, %c0_19] : memref<16x32xf32, #tpu.memory_space<vmem>>, vector<16x32xf32>
      %c0_20 = arith.constant 0 : index
      %c0_21 = arith.constant 0 : index
      %46 = vector.load %arg3[%c0_20, %c0_21] : memref<1x32xf32, #tpu.memory_space<vmem>>, vector<1x32xf32>
      %47 = vector.broadcast %46 : vector<1x32xf32> to vector<16x32xf32>
      %48 = arith.addf %45, %47 : vector<16x32xf32>
      %49 = vector.broadcast %37 : vector<16x1xf32> to vector<16x32xf32>
      %50 = arith.mulf %48, %49 : vector<16x32xf32>
      %cst_22 = arith.constant dense<0.000000e+00> : vector<32xf32>
      %51 = vector.multi_reduction <add>, %50, %cst_22 [0] : vector<16x32xf32> to vector<32xf32>
      %52 = vector.shape_cast %51 : vector<32xf32> to vector<1x32xf32>
      %53 = vector.broadcast %42 : f32 to vector<1x32xf32>
      %54 = arith.mulf %52, %53 : vector<1x32xf32>
      %55 = vector.broadcast %54 : vector<1x32xf32> to vector<16x32xf32>
      %56 = arith.subf %48, %55 : vector<16x32xf32>
      %57 = arith.mulf %56, %56 : vector<16x32xf32>
      %58 = vector.broadcast %37 : vector<16x1xf32> to vector<16x32xf32>
      %59 = arith.mulf %57, %58 : vector<16x32xf32>
      %cst_23 = arith.constant dense<0.000000e+00> : vector<32xf32>
      %60 = vector.multi_reduction <add>, %59, %cst_23 [0] : vector<16x32xf32> to vector<32xf32>
      %61 = vector.shape_cast %60 : vector<32xf32> to vector<1x32xf32>
      %62 = vector.broadcast %42 : f32 to vector<1x32xf32>
      %63 = arith.mulf %61, %62 : vector<1x32xf32>
      %cst_24 = arith.constant 9.99999974E-6 : f32
      %64 = vector.broadcast %cst_24 : f32 to vector<1x32xf32>
      %65 = arith.addf %63, %64 : vector<1x32xf32>
      %66 = math.rsqrt %65 : vector<1x32xf32>
      %c0_25 = arith.constant 0 : index
      %c0_26 = arith.constant 0 : index
      %67 = vector.load %arg4[%c0_25, %c0_26] : memref<1x32xf32, #tpu.memory_space<vmem>>, vector<1x32xf32>
      %68 = arith.mulf %66, %67 : vector<1x32xf32>
      %69 = vector.broadcast %68 : vector<1x32xf32> to vector<16x32xf32>
      %70 = arith.mulf %56, %69 : vector<16x32xf32>
      %c0_27 = arith.constant 0 : index
      %c0_28 = arith.constant 0 : index
      %71 = vector.load %arg5[%c0_27, %c0_28] : memref<1x32xf32, #tpu.memory_space<vmem>>, vector<1x32xf32>
      %72 = vector.broadcast %71 : vector<1x32xf32> to vector<16x32xf32>
      %73 = arith.addf %70, %72 : vector<16x32xf32>
      %cst_29 = arith.constant 0.000000e+00 : f32
      %74 = vector.broadcast %cst_29 : f32 to vector<16x32xf32>
      %75 = arith.cmpf ogt, %73, %74 : vector<16x32xf32>
      %76 = vector.broadcast %43 : f32 to vector<16x32xf32>
      %77 = arith.mulf %76, %73 : vector<16x32xf32>
      %78 = arith.select %75, %73, %77 : vector<16x32xi1>, vector<16x32xf32>
      %c0_30 = arith.constant 0 : index
      %c0_31 = arith.constant 0 : index
      %79 = vector.load %arg6[%c0_30, %c0_31] : memref<32x32xf32, #tpu.memory_space<vmem>>, vector<32x32xf32>
      %cst_32 = arith.constant dense<0.000000e+00> : vector<16x32xf32>
      %80 = tpu.matmul %78, %79, %cst_32 {dimension_numbers = #tpu.dot_dimension_numbers<[1], [0], [0], [1], [0, 0, 1, 1], [], []>} : vector<16x32xf32>, vector<32x32xf32>, vector<16x32xf32> -> vector<16x32xf32>
      %c0_33 = arith.constant 0 : index
      %c0_34 = arith.constant 0 : index
      %81 = vector.load %arg7[%c0_33, %c0_34] : memref<1x32xf32, #tpu.memory_space<vmem>>, vector<1x32xf32>
      %82 = vector.broadcast %81 : vector<1x32xf32> to vector<16x32xf32>
      %83 = arith.addf %80, %82 : vector<16x32xf32>
      %84 = vector.broadcast %37 : vector<16x1xf32> to vector<16x32xf32>
      %85 = arith.mulf %83, %84 : vector<16x32xf32>
      %cst_35 = arith.constant dense<0.000000e+00> : vector<32xf32>
      %86 = vector.multi_reduction <add>, %85, %cst_35 [0] : vector<16x32xf32> to vector<32xf32>
      %87 = vector.shape_cast %86 : vector<32xf32> to vector<1x32xf32>
      %88 = vector.broadcast %42 : f32 to vector<1x32xf32>
      %89 = arith.mulf %87, %88 : vector<1x32xf32>
      %90 = vector.broadcast %89 : vector<1x32xf32> to vector<16x32xf32>
      %91 = arith.subf %83, %90 : vector<16x32xf32>
      %92 = arith.mulf %91, %91 : vector<16x32xf32>
      %93 = vector.broadcast %37 : vector<16x1xf32> to vector<16x32xf32>
      %94 = arith.mulf %92, %93 : vector<16x32xf32>
      %cst_36 = arith.constant dense<0.000000e+00> : vector<32xf32>
      %95 = vector.multi_reduction <add>, %94, %cst_36 [0] : vector<16x32xf32> to vector<32xf32>
      %96 = vector.shape_cast %95 : vector<32xf32> to vector<1x32xf32>
      %97 = vector.broadcast %42 : f32 to vector<1x32xf32>
      %98 = arith.mulf %96, %97 : vector<1x32xf32>
      %cst_37 = arith.constant 9.99999974E-6 : f32
      %99 = vector.broadcast %cst_37 : f32 to vector<1x32xf32>
      %100 = arith.addf %98, %99 : vector<1x32xf32>
      %101 = math.rsqrt %100 : vector<1x32xf32>
      %c0_38 = arith.constant 0 : index
      %c0_39 = arith.constant 0 : index
      %102 = vector.load %arg8[%c0_38, %c0_39] : memref<1x32xf32, #tpu.memory_space<vmem>>, vector<1x32xf32>
      %103 = arith.mulf %101, %102 : vector<1x32xf32>
      %104 = vector.broadcast %103 : vector<1x32xf32> to vector<16x32xf32>
      %105 = arith.mulf %91, %104 : vector<16x32xf32>
      %c0_40 = arith.constant 0 : index
      %c0_41 = arith.constant 0 : index
      %106 = vector.load %arg9[%c0_40, %c0_41] : memref<1x32xf32, #tpu.memory_space<vmem>>, vector<1x32xf32>
      %107 = vector.broadcast %106 : vector<1x32xf32> to vector<16x32xf32>
      %108 = arith.addf %105, %107 : vector<16x32xf32>
      %cst_42 = arith.constant 0.000000e+00 : f32
      %109 = vector.broadcast %cst_42 : f32 to vector<16x32xf32>
      %110 = arith.cmpf ogt, %108, %109 : vector<16x32xf32>
      %111 = vector.broadcast %44 : f32 to vector<16x32xf32>
      %112 = arith.mulf %111, %108 : vector<16x32xf32>
      %113 = arith.select %110, %108, %112 : vector<16x32xi1>, vector<16x32xf32>
      %c0_43 = arith.constant 0 : index
      %c0_44 = arith.constant 0 : index
      %114 = vector.load %arg11[%c0_43, %c0_44] : memref<16x32xf32, #tpu.memory_space<vmem>>, vector<16x32xf32>
      tpu.vector_store %arg11[%c0_43, %c0_44], %113 {strides = array<i32>} : memref<16x32xf32, #tpu.memory_space<vmem>>, vector<16x32xf32>,
    } else {
    }
    return
  }
  func.func @transform_0(%arg0: i32) -> (i32, i32) {
    %c0_i32 = arith.constant 0 : i32
    %c0_i32_0 = arith.constant 0 : i32
    return %c0_i32, %arg0 : i32, i32
  }
  func.func @transform_1(%arg0: i32) -> (i32, i32) {
    %c0_i32 = arith.constant 0 : i32
    %c0_i32_0 = arith.constant 0 : i32
    %c0_i32_1 = arith.constant 0 : i32
    return %c0_i32, %c0_i32_0 : i32, i32
  }
  func.func @transform_2(%arg0: i32) -> (i32, i32) {
    %c0_i32 = arith.constant 0 : i32
    %c0_i32_0 = arith.constant 0 : i32
    %c0_i32_1 = arith.constant 0 : i32
    return %c0_i32, %c0_i32_0 : i32, i32
  }
  func.func @transform_3(%arg0: i32) -> (i32, i32) {
    %c0_i32 = arith.constant 0 : i32
    %c0_i32_0 = arith.constant 0 : i32
    %c0_i32_1 = arith.constant 0 : i32
    return %c0_i32, %c0_i32_0 : i32, i32
  }
  func.func @transform_4(%arg0: i32) -> (i32, i32) {
    %c0_i32 = arith.constant 0 : i32
    %c0_i32_0 = arith.constant 0 : i32
    %c0_i32_1 = arith.constant 0 : i32
    return %c0_i32, %c0_i32_0 : i32, i32
  }
  func.func @transform_5(%arg0: i32) -> (i32, i32) {
    %c0_i32 = arith.constant 0 : i32
    %c0_i32_0 = arith.constant 0 : i32
    %c0_i32_1 = arith.constant 0 : i32
    return %c0_i32, %c0_i32_0 : i32, i32
  }
  func.func @transform_6(%arg0: i32) -> (i32, i32) {
    %c0_i32 = arith.constant 0 : i32
    %c0_i32_0 = arith.constant 0 : i32
    %c0_i32_1 = arith.constant 0 : i32
    return %c0_i32, %c0_i32_0 : i32, i32
  }
  func.func @transform_7(%arg0: i32) -> (i32, i32) {
    %c0_i32 = arith.constant 0 : i32
    %c0_i32_0 = arith.constant 0 : i32
    %c0_i32_1 = arith.constant 0 : i32
    return %c0_i32, %c0_i32_0 : i32, i32
  }
  func.func @transform_8(%arg0: i32) -> (i32, i32) {
    %c0_i32 = arith.constant 0 : i32
    %c0_i32_0 = arith.constant 0 : i32
    %c0_i32_1 = arith.constant 0 : i32
    return %c0_i32, %c0_i32_0 : i32, i32
  }
  func.func @transform_9(%arg0: i32) -> i32 {
    %c0_i32 = arith.constant 0 : i32
    %c0_i32_0 = arith.constant 0 : i32
    return %c0_i32 : i32
  }
  func.func @transform_10(%arg0: i32) -> (i32, i32) {
    %c0_i32 = arith.constant 0 : i32
    %c0_i32_0 = arith.constant 0 : i32
    %c0_i32_1 = arith.constant 0 : i32
    return %c0_i32, %c0_i32_0 : i32, i32
  }
}

module attributes {stable_mosaic.version = 11 : i64} {
  func.func @_lookup_kernel(%arg0: i32, %arg1: memref<8x4xi32, #tpu.memory_space<vmem>>, %arg2: memref<64x128xf32, #tpu.memory_space<vmem>>, %arg3: memref<8x128xf32, #tpu.memory_space<vmem>>) attributes {dimension_semantics = [#tpu.dimension_semantics<parallel>], iteration_bounds = array<i64: 1>, scalar_prefetch = 0 : i64, scratch_operands = 0 : i64, tpu.core_type = #tpu.core_type<tc>, window_params = [{transform_indices = @transform_0, window_bounds = array<i64: 8, 4>}, {pipeline_mode = #tpu.pipeline_mode<synchronous>, transform_indices = @transform_1, window_bounds = array<i64: 64, 128>}, {transform_indices = @transform_2, window_bounds = array<i64: 8, 128>}]} {
    %0 = tpu.iota {dimensions = array<i32: 1>} : vector<8x64xi32>
    %cst = arith.constant 0.000000e+00 : f32
    %1 = vector.broadcast %cst : f32 to vector<8x64xf32>
    %c0 = arith.constant 0 : index
    %c0_0 = arith.constant 0 : index
    %2 = vector.load %arg1[%c0, %c0_0] : memref<8x4xi32, #tpu.memory_space<vmem>>, vector<8x1xi32>
    %c0_i32 = arith.constant 0 : i32
    %3 = vector.broadcast %c0_i32 : i32 to vector<8x1xi32>
    %4 = arith.addi %2, %3 : vector<8x1xi32>
    %5 = vector.broadcast %4 : vector<8x1xi32> to vector<8x64xi32>
    %6 = arith.cmpi eq, %0, %5 : vector<8x64xi32>
    %7 = arith.extui %6 : vector<8x64xi1> to vector<8x64xi32>
    %8 = arith.sitofp %7 : vector<8x64xi32> to vector<8x64xf32>
    %9 = arith.addf %1, %8 : vector<8x64xf32>
    %c0_1 = arith.constant 0 : index
    %c1 = arith.constant 1 : index
    %10 = vector.load %arg1[%c0_1, %c1] : memref<8x4xi32, #tpu.memory_space<vmem>>, vector<8x1xi32>
    %c16_i32 = arith.constant 16 : i32
    %11 = vector.broadcast %c16_i32 : i32 to vector<8x1xi32>
    %12 = arith.addi %10, %11 : vector<8x1xi32>
    %13 = vector.broadcast %12 : vector<8x1xi32> to vector<8x64xi32>
    %14 = arith.cmpi eq, %0, %13 : vector<8x64xi32>
    %15 = arith.extui %14 : vector<8x64xi1> to vector<8x64xi32>
    %16 = arith.sitofp %15 : vector<8x64xi32> to vector<8x64xf32>
    %17 = arith.addf %9, %16 : vector<8x64xf32>
    %c0_2 = arith.constant 0 : index
    %c2 = arith.constant 2 : index
    %18 = vector.load %arg1[%c0_2, %c2] : memref<8x4xi32, #tpu.memory_space<vmem>>, vector<8x1xi32>
    %c32_i32 = arith.constant 32 : i32
    %19 = vector.broadcast %c32_i32 : i32 to vector<8x1xi32>
    %20 = arith.addi %18, %19 : vector<8x1xi32>
    %21 = vector.broadcast %20 : vector<8x1xi32> to vector<8x64xi32>
    %22 = arith.cmpi eq, %0, %21 : vector<8x64xi32>
    %23 = arith.extui %22 : vector<8x64xi1> to vector<8x64xi32>
    %24 = arith.sitofp %23 : vector<8x64xi32> to vector<8x64xf32>
    %25 = arith.addf %17, %24 : vector<8x64xf32>
    %c0_3 = arith.constant 0 : index
    %c3 = arith.constant 3 : index
    %26 = vector.load %arg1[%c0_3, %c3] : memref<8x4xi32, #tpu.memory_space<vmem>>, vector<8x1xi32>
    %c48_i32 = arith.constant 48 : i32
    %27 = vector.broadcast %c48_i32 : i32 to vector<8x1xi32>
    %28 = arith.addi %26, %27 : vector<8x1xi32>
    %29 = vector.broadcast %28 : vector<8x1xi32> to vector<8x64xi32>
    %30 = arith.cmpi eq, %0, %29 : vector<8x64xi32>
    %31 = arith.extui %30 : vector<8x64xi1> to vector<8x64xi32>
    %32 = arith.sitofp %31 : vector<8x64xi32> to vector<8x64xf32>
    %33 = arith.addf %25, %32 : vector<8x64xf32>
    %c0_4 = arith.constant 0 : index
    %c0_5 = arith.constant 0 : index
    %34 = vector.load %arg2[%c0_4, %c0_5] : memref<64x128xf32, #tpu.memory_space<vmem>>, vector<64x128xf32>
    %cst_6 = arith.constant dense<0.000000e+00> : vector<8x128xf32>
    %35 = tpu.matmul %33, %34, %cst_6 {dimension_numbers = #tpu.dot_dimension_numbers<[1], [0], [0], [1], [0, 0, 1, 1], [], []>} : vector<8x64xf32>, vector<64x128xf32>, vector<8x128xf32> -> vector<8x128xf32>
    %c0_7 = arith.constant 0 : index
    %c0_8 = arith.constant 0 : index
    %36 = vector.load %arg3[%c0_7, %c0_8] : memref<8x128xf32, #tpu.memory_space<vmem>>, vector<8x128xf32>
    tpu.vector_store %arg3[%c0_7, %c0_8], %35 {strides = array<i32>} : memref<8x128xf32, #tpu.memory_space<vmem>>, vector<8x128xf32>,
    return
  }
  func.func @transform_0(%arg0: i32) -> (i32, i32) {
    %c0_i32 = arith.constant 0 : i32
    %c0_i32_0 = arith.constant 0 : i32
    return %arg0, %c0_i32 : i32, i32
  }
  func.func @transform_1(%arg0: i32) -> (i32, i32) {
    %c0_i32 = arith.constant 0 : i32
    %c0_i32_0 = arith.constant 0 : i32
    %c0_i32_1 = arith.constant 0 : i32
    return %c0_i32, %c0_i32_0 : i32, i32
  }
  func.func @transform_2(%arg0: i32) -> (i32, i32) {
    %c0_i32 = arith.constant 0 : i32
    %c0_i32_0 = arith.constant 0 : i32
    return %arg0, %c0_i32 : i32, i32
  }
}

</mosaic_0001>

<bundles_post_ra>
// kernel: pos_encoder_forward.2
= control target key start
LH: loop header
LB: loop body
LE: loop exit
PB: predicated region body
PF: predicated region fallthrough
CT: control target
= control target key end

     0   :  { %15 = vsyncpa [#allocation4], 0  ;;  %s610_s0 = inlined_call_operand.vmem [shape: s32[4,8], index: 0, kind: input, shape index: {}]   ;;  %s611_s1 = inlined_call_operand.vmem [shape: f32[16,32], index: 1, kind: input, shape index: {}]   ;;  %s612_s2 = inlined_call_operand.vmem [shape: f32[1,32], index: 2, kind: input, shape index: {}]   ;;  %s613_s3 = inlined_call_operand.vmem [shape: f32[1,32], index: 3, kind: input, shape index: {}]   ;;  %s614_s4 = inlined_call_operand.vmem [shape: f32[1,32], index: 4, kind: input, shape index: {}]   ;;  %s615_s5 = inlined_call_operand.vmem [shape: f32[32,32], index: 5, kind: input, shape index: {}]   ;;  %s616_s6 = inlined_call_operand.vmem [shape: f32[1,32], index: 6, kind: input, shape index: {}]   ;;  %s617_s7 = inlined_call_operand.vmem [shape: f32[1,32], index: 7, kind: input, shape index: {}]   ;;  %s618_s8 = inlined_call_operand.vmem [shape: f32[1,32], index: 8, kind: input, shape index: {}]   ;;  %s619_s9 = inlined_call_operand.vmem [shape: f32[2], index: 9, kind: input, shape index: {}]   ;;  %s620_s10 = inlined_call_operand.vmem [shape: f32[16,32], index: 10, kind: output, shape index: {}]  }
   0x1   :  { %s40_s15 = sshll.u32 %s619_s9, 4  ;;  %s41_s15 = int_to_ptr.vmem [resolvable:$true] %s40_s15 }
   0x2   :  { %s435_s16 = scalar_lea.vmem %s41_s15, 16  ;;  %p440_p1 = scmp.lt.s32.totalorder %s41_s15, %s41_s15 }
   0x3   :  { %p436_p0 = scmp.ne.s32.totalorder %s41_s15, %s435_s16  ;;  %p441_p2 = scmp.lt.s32.totalorder %s435_s16, %s435_s16 }
   0x5   :  { %p442_p3 = por %p441_p2, %p440_p1 }
   0x7   :  { %p443_p4 = pnand %p442_p3, %p436_p0 }
   0x9   :  { %446 = shalt.err (!%p443_p4)
}
   0xa   :  { %s449_s17 = smov [#allocation3]  }
   0xb   :  { %43 = dma.vmem_to_smem %s41_s15, 16, %s449_s17, [#allocation4]  }
   0xc   :  { %447 = dma.done.wait [#allocation4], 16  }
   0xd   :  { %448 = vsyncadd [#allocation4], 4294967280 }
   0xe   :  { %47 = sfence }
   0xf   :  { %v55_v0 = vlaneseq  ;;  %v376_v1 = vld [vmem:[%s610_s0] ss:$0 sm:$0xff]  ;;  %v379_v2 = vld [vmem:[%s610_s0 + $0x1] ss:$0 sm:$0xff]  ;;  %v382_v3 = vld [vmem:[%s610_s0 + $0x2] ss:$0 sm:$0xff] }
  0x10   :  { %v385_v4 = vld [vmem:[%s610_s0 + $0x3] ss:$0 sm:$0xff]  ;;  %v450_v6 = vmov 0.0   ;;  %vm112_vm4 = vcmask 64512   ;;  %vm52_vm9 = vcmask 7168   ;;  %v451_v24 = vmov 0  }
  0x11   :  { %v522_v5 = vshrl.u32 %v55_v0, 7  ;;  %53 = vst.msk [vmem:[#allocation2] sm:$0xff] %vm52_vm9, %v450_v6  ;;  %54 = vst.msk [vmem:[#allocation2 + $0x8] sm:$0xff] %vm52_vm9, %v450_v6  ;;  %428 = vset.pattern.permute.xlu0 %v451_v24  ;;  %427 = vset.pattern.permute.xlu1 %v451_v24  ;;  %v223_v43 = vld [vmem:[%s615_s5] sm:$0xff]  ;;  %v224_v44 = vld [vmem:[%s615_s5 + $0x8] sm:$0xff]  ;;  %vm169_vm10 = vcmask 261120  }
  0x12   :  { %v412_v45 = vpack.c.bf16 %v224_v44, %v223_v43  ;;  %v225_v46 = vld [vmem:[%s615_s5 + $0x10] sm:$0xff]  ;;  %v226_v47 = vld [vmem:[%s615_s5 + $0x18] sm:$0xff]  ;;  %v146_v51 = vld [vmem:[%s611_s1] sm:$0xff]  ;;  %s144_s19 = sld [smem:[#allocation3]] }
  0x13   :  { %vm63_vm0 = vcmp.eq.s32.totalorder %v522_v5, %v376_v1  ;;  %vm76_vm1 = vcmp.eq.s32.totalorder %v522_v5, %v379_v2  ;;  %vm89_vm2 = vcmp.eq.s32.totalorder %v522_v5, %v382_v3  ;;  %vm102_vm3 = vcmp.eq.s32.totalorder %v522_v5, %v385_v4  ;;  %v147_v52 = vld [vmem:[%s611_s1 + $0x8] sm:$0xff]  ;;  %v389_v53 = vld [vmem:[%s612_s2] ss:$0 sm:$0xff] }
  0x14   :  { %v377_v7 = vsel %vm63_vm0, 1.0, %v450_v6  ;;  %v380_v8 = vsel %vm76_vm1, 1.0, %v450_v6  ;;  %v383_v9 = vsel %vm89_vm2, 1.0, %v450_v6  ;;  %v57_v11 = vadd.s32 8, %v522_v5  ;;  %413 = vmatprep.subr.bf16.mxu0 %v412_v45 }
  0x15   :  { %v82_v10 = vadd.f32 %v380_v8, %v377_v7  ;;  %v386_v12 = vsel %vm102_vm3, 1.0, %v450_v6  ;;  %415 = vmatpush3.bf16.msra.mxu0 %v412_v45  ;;  %v416_v48 = vpack.c.bf16 %v226_v47, %v225_v46  ;;  %v155_v54 = vadd.f32 %v389_v53, %v146_v51 }
  0x16   :  { %vm64_vm5 = vcmp.eq.s32.totalorder %v57_v11, %v376_v1  ;;  %vm77_vm6 = vcmp.eq.s32.totalorder %v57_v11, %v379_v2  ;;  %vm90_vm7 = vcmp.eq.s32.totalorder %v57_v11, %v382_v3  ;;  %vm103_vm8 = vcmp.eq.s32.totalorder %v57_v11, %v385_v4 }
  0x17   :  { %v95_v13 = vadd.f32 %v383_v9, %v82_v10  ;;  %v378_v14 = vsel %vm64_vm5, 1.0, %v450_v6  ;;  %v381_v15 = vsel %vm77_vm6, 1.0, %v450_v6  ;;  %v384_v16 = vsel %vm90_vm7, 1.0, %v450_v6  ;;  %417 = vmatprep.subr.bf16.mxu0 %v416_v48 }
  0x18   :  { %v83_v18 = vadd.f32 %v381_v15, %v378_v14  ;;  %v387_v19 = vsel %vm103_vm8, 1.0, %v450_v6  ;;  %v110_v25 = vld [vmem:[#allocation2] sm:$0xff]  ;;  %v111_v28 = vld [vmem:[#allocation2 + $0x8] sm:$0xff]  ;;  %v156_v56 = vadd.f32 %v389_v53, %v147_v52 }
  0x19   :  { %v108_v17 = vadd.f32 %v386_v12, %v95_v13  ;;  %419 = vmatpush3.bf16.msra.mxu0 %v416_v48 }
  0x1a   :  { %v96_v21 = vadd.f32 %v384_v16, %v83_v18 }
  0x1b   :  { %v113_v20 = vsel %vm112_vm4, %v108_v17, 0.0 }
  0x1c   :  { %114 = vadd.xlane.f32.xlu0 %v113_v20  ;;  %v109_v22 = vadd.f32 %v387_v19, %v96_v21 }
  0x1e   :  { %v116_v23 = vsel %vm112_vm4, %v109_v22, 0.0 }
  0x20   :  { %117 = vadd.xlane.f32.xlu0 %v116_v23 }
  0xa9   :  { %v115_v26 = vpop.xlane.xlu0 %114 }
  0xaa   :  { %v119_v27 = vadd.f32 %v115_v26, %v110_v25  ;;  %v199_v25 = vld [vmem:[%s613_s3] sm:$0x1]  ;;  %v203_v26 = vsub.s32 0, %v522_v5 }
  0xab   :  { %v391_v5 = vld [vmem:[%s616_s6] ss:$0 sm:$0xff] }
  0xac   :  { %122 = vst.msk [vmem:[#allocation2] sm:$0xff] %vm52_vm9, %v119_v27 }
  0xad   :  { %v118_v29 = vpop.xlane.xlu0 %117 }
  0xae   :  { %v120_v30 = vadd.f32 %v118_v29, %v111_v28 }
  0xb0   :  { %123 = vst.msk [vmem:[#allocation2 + $0x8] sm:$0xff] %vm52_vm9, %v120_v30  ;;  %v390_v30 = vld [vmem:[%s614_s4] ss:$0 sm:$0xff]  ;;  %s388_s4 = sld [smem:[#allocation3 + $0x1]] }
  0xb3   :  { %v127_v31 = vld [vmem:[#allocation2] sm:$0xff] }
  0xb4   :  { %v129_v33 = vsel %vm52_vm9, %v127_v31, 0.0 }
  0xb7   :  { %v128_v32 = vld [vmem:[#allocation2 + $0x8] sm:$0xff] }
  0xb8   :  { %164 = vperm.xlu0 %428, %v128_v32   ;;  %v130_v34 = vsel %vm52_vm9, %v128_v32, 0.0 }
  0xb9   :  { %v131_v35 = vadd.f32 %v130_v34, %v129_v33  ;;  %v218_v33 = vstv %s144_s19 }
  0xbb   :  { %132 = vadd.xlane.f32.xlu1 %v131_v35 }
  0xcc   :  { %159 = vperm.xlu1 %427, %v127_v31  }
 0x137   :  { %v560_v57 = vpop.permute.xlu0 %164 }
 0x138   :  { %v168_v59 = vmul.f32 %v560_v57, %v156_v56 }
 0x13a   :  { %v171_v61 = vsel %vm169_vm10, %v168_v59, 0.0 }
 0x148   :  { %v133_v36 = vpop.xlane.xlu1 %132 }
 0x149   :  { %v134_v37 = vrot.slane %v133_v36, 4 }
 0x14b   :  { %v135_v38 = vadd.f32 %v134_v37, %v133_v36 }
 0x14c   :  { %v558_v55 = vpop.permute.xlu1 %159 }
 0x14d   :  { %v136_v39 = vrot.slane %v135_v38, 2  ;;  %v167_v58 = vmul.f32 %v558_v55, %v155_v54 }
 0x14f   :  { %v137_v40 = vadd.f32 %v136_v39, %v135_v38  ;;  %v170_v60 = vsel %vm169_vm10, %v167_v58, 0.0 }
 0x150   :  { %v172_v62 = vadd.f32 %v171_v61, %v170_v60 }
 0x151   :  { %v138_v41 = vrot.slane %v137_v40, 1 }
 0x152   :  { %v173_v63 = vrot.slane %v172_v62, 4 }
 0x153   :  { %v139_v42 = vadd.f32 %v138_v41, %v137_v40 }
 0x154   :  { %v174_v0 = vadd.f32 %v173_v63, %v172_v62 }
 0x155   :  { %420 = vpush %v139_v42 }
 0x156   :  { %v175_v1 = vrot.slane %v174_v0, 2 }
 0x158   :  { %v176_v2 = vadd.f32 %v175_v1, %v174_v0 }
 0x15a   :  { %v177_v3 = vrot.slane %v176_v2, 1 }
 0x15c   :  { %v178_v4 = vadd.f32 %v177_v3, %v176_v2 }
 0x186   :  { %s421_s12 = spop %420 }
 0x187   :  { %v141_v49 = vstv %s421_s12 }
 0x188   :  { %429 = vrcp.f32 %v141_v49 }
 0x192   :  { %v430_v50 = vpop.eup %429 }
 0x193   :  { %422 = vpush %v430_v50 }
 0x1c4   :  { %s423_s1 = spop %422 }
 0x1c5   :  { %v566_v6 = vstv %s423_s1 }
 0x1c6   :  { %v180_v7 = vmul.f32 %v566_v6, %v178_v4 }
 0x1c8   :  { %v181_v8 = vsub.f32 %v155_v54, %v180_v7  ;;  %v182_v9 = vsub.f32 %v156_v56, %v180_v7 }
 0x1ca   :  { %v183_v10 = vmul.f32 %v181_v8, %v181_v8  ;;  %v184_v11 = vmul.f32 %v182_v9, %v182_v9 }
 0x1cc   :  { %v185_v12 = vmul.f32 %v183_v10, %v558_v55  ;;  %v186_v13 = vmul.f32 %v184_v11, %v560_v57 }
 0x1ce   :  { %v187_v14 = vsel %vm169_vm10, %v185_v12, 0.0  ;;  %v188_v15 = vsel %vm169_vm10, %v186_v13, 0.0 }
 0x1cf   :  { %v189_v16 = vadd.f32 %v188_v15, %v187_v14  ;;  %v394_v15 = vld [vmem:[%s618_s8] ss:$0 sm:$0xff] }
 0x1d1   :  { %v190_v17 = vrot.slane %v189_v16, 4 }
 0x1d3   :  { %v191_v18 = vadd.f32 %v190_v17, %v189_v16 }
 0x1d5   :  { %v192_v19 = vrot.slane %v191_v18, 2 }
 0x1d7   :  { %v193_v20 = vadd.f32 %v192_v19, %v191_v18  ;;  %v364_v18 = vstv %s388_s4 }
 0x1d9   :  { %v194_v21 = vrot.slane %v193_v20, 1 }
 0x1db   :  { %v195_v22 = vadd.f32 %v194_v21, %v193_v20 }
 0x1dd   :  { %v196_v23 = vmul.f32 %v195_v22, %v566_v6 }
 0x1df   :  { %v197_v24 = vadd.f32 1e-05, %v196_v23 }
 0x1e1   :  { %431 = vrsqrt.f32 %v197_v24 }
 0x1eb   :  { %v432_v27 = vpop.eup %431 }
 0x1ec   :  { %v200_v28 = vmul.f32 %v432_v27, %v199_v25 }
 0x1ee   :  { %v204_v29 = vrot.slane %v200_v28, %v203_v26 }
 0x1f0   :  { %v206_v31 = vmul.f32 %v204_v29, %v182_v9  ;;  %v205_v32 = vmul.f32 %v204_v29, %v181_v8 }
 0x1f2   :  { %v214_v34 = vadd.f32 %v390_v30, %v205_v32  ;;  %v215_v35 = vadd.f32 %v390_v30, %v206_v31 }
 0x1f4   :  { %vm216_vm11 = vcmp.gt.f32.partialorder %v214_v34, 0.0  ;;  %v219_v36 = vmul.f32 %v218_v33, %v214_v34  ;;  %v220_v37 = vmul.f32 %v218_v33, %v215_v35  ;;  %vm217_vm12 = vcmp.gt.f32.partialorder %v215_v35, 0.0 }
 0x1f6   :  { %v221_v38 = vsel %vm216_vm11, %v214_v34, %v219_v36  ;;  %v222_v39 = vsel %vm217_vm12, %v215_v35, %v220_v37 }
 0x1f7   :  { %409 = vmatprep.mubr.msk.f32.mxu0 %vm169_vm10, %v221_v38 }
 0x1f8   :  { %410 = vmatmul.mubr.msk.f32.vlgmr.msra.gmra.mrb[0].mxu0 %vm169_vm10, %v222_v39 }
 0x2cb   :  { %v411_v40 = vpop.f32.mrb[0].mxu0 }
 0x2cc   :  { %v312_v41 = vadd.f32 %v411_v40, %v391_v5  ;;  %v306_v42 = vpop.f32.mrb[1].mxu0 }
 0x2cd   :  { %v307_v43 = vadd.f32 %v391_v5, %v306_v42 }
 0x2ce   :  { %v316_v44 = vmul.f32 %v312_v41, %v560_v57 }
 0x2cf   :  { %v315_v45 = vmul.f32 %v307_v43, %v558_v55 }
 0x2d0   :  { %v318_v46 = vsel %vm169_vm10, %v316_v44, 0.0 }
 0x2d1   :  { %v317_v47 = vsel %vm169_vm10, %v315_v45, 0.0 }
 0x2d2   :  { %v319_v48 = vadd.f32 %v318_v46, %v317_v47 }
 0x2d4   :  { %v320_v49 = vrot.slane %v319_v48, 4 }
 0x2d6   :  { %v321_v50 = vadd.f32 %v320_v49, %v319_v48 }
 0x2d8   :  { %v322_v51 = vrot.slane %v321_v50, 2 }
 0x2da   :  { %v323_v52 = vadd.f32 %v322_v51, %v321_v50 }
 0x2dc   :  { %v324_v53 = vrot.slane %v323_v52, 1 }
 0x2de   :  { %v325_v54 = vadd.f32 %v324_v53, %v323_v52 }
 0x2e0   :  { %v326_v56 = vmul.f32 %v325_v54, %v566_v6 }
 0x2e2   :  { %v327_v58 = vsub.f32 %v307_v43, %v326_v56  ;;  %v328_v59 = vsub.f32 %v312_v41, %v326_v56 }
 0x2e4   :  { %v329_v60 = vmul.f32 %v327_v58, %v327_v58  ;;  %v330_v61 = vmul.f32 %v328_v59, %v328_v59 }
 0x2e6   :  { %v331_v62 = vmul.f32 %v329_v60, %v558_v55  ;;  %v332_v63 = vmul.f32 %v330_v61, %v560_v57  ;;  %v345_v55 = vld [vmem:[%s617_s7] sm:$0x1] }
 0x2e8   :  { %v333_v0 = vsel %vm169_vm10, %v331_v62, 0.0  ;;  %v334_v1 = vsel %vm169_vm10, %v332_v63, 0.0 }
 0x2e9   :  { %v335_v2 = vadd.f32 %v334_v1, %v333_v0 }
 0x2eb   :  { %v336_v3 = vrot.slane %v335_v2, 4 }
 0x2ed   :  { %v337_v4 = vadd.f32 %v336_v3, %v335_v2 }
 0x2ef   :  { %v338_v7 = vrot.slane %v337_v4, 2 }
 0x2f1   :  { %v339_v8 = vadd.f32 %v338_v7, %v337_v4 }
 0x2f3   :  { %v340_v9 = vrot.slane %v339_v8, 1 }
 0x2f5   :  { %v341_v10 = vadd.f32 %v340_v9, %v339_v8 }
 0x2f7   :  { %v342_v11 = vmul.f32 %v341_v10, %v566_v6 }
 0x2f9   :  { %v343_v12 = vadd.f32 1e-05, %v342_v11 }
 0x2fb   :  { %433 = vrsqrt.f32 %v343_v12 }
 0x305   :  { %v434_v57 = vpop.eup %433 }
 0x306   :  { %v346_v13 = vmul.f32 %v434_v57, %v345_v55 }
 0x308   :  { %v350_v14 = vrot.slane %v346_v13, %v203_v26 }
 0x30a   :  { %v351_v16 = vmul.f32 %v350_v14, %v327_v58  ;;  %v352_v17 = vmul.f32 %v350_v14, %v328_v59 }
 0x30c   :  { %v360_v19 = vadd.f32 %v394_v15, %v351_v16  ;;  %v361_v20 = vadd.f32 %v394_v15, %v352_v17 }
 0x30e   :  { %vm362_vm13 = vcmp.gt.f32.partialorder %v360_v19, 0.0  ;;  %vm363_vm14 = vcmp.gt.f32.partialorder %v361_v20, 0.0  ;;  %v365_v6 = vmul.f32 %v364_v18, %v360_v19  ;;  %v366_v21 = vmul.f32 %v364_v18, %v361_v20 }
 0x310   :  { %v367_v22 = vsel %vm362_vm13, %v360_v19, %v365_v6  ;;  %v368_v23 = vsel %vm363_vm14, %v361_v20, %v366_v21 }
 0x311   :  { %369 = vst.msk [vmem:[%s620_s10] sm:$0xff] %vm169_vm10, %v367_v22  ;;  %370 = vst.msk [vmem:[%s620_s10 + $0x8] sm:$0xff] %vm169_vm10, %v368_v23 }
 0x312   :  { %375 = vsyncpa [#allocation4], 1 }

// kernel: pos_encoder_forward.3
= control target key start
LH: loop header
LB: loop body
LE: loop exit
PB: predicated region body
PF: predicated region fallthrough
CT: control target
= control target key end

     0   :  { %v189_v0 = vmov 0   ;;  %v190_v2 = vmov 2   ;;  %v191_v6 = vmov 0.0|0.0   ;;  %v192_v15 = vmov 1   ;;  %s241_s0 = inlined_call_operand.vmem [shape: s32[8,4], index: 0, kind: input, shape index: {}]   ;;  %s242_s1 = inlined_call_operand.vmem [shape: f32[64,128], index: 1, kind: input, shape index: {}]   ;;  %s243_s2 = inlined_call_operand.vmem [shape: f32[8,128], index: 2, kind: output, shape index: {}]  }
   0x1   :  { %184 = vset.pattern.permute.xlu0 %v189_v0  ;;  %v13_v1 = vld [vmem:[%s241_s0] sm:$0xff]  ;;  %186 = vset.pattern.permute.xlu1 %v190_v2  ;;  %v46_v4 = vld [vmem:[%s242_s1 + $0x8] sm:$0xff]  ;;  %v47_v8 = vld [vmem:[%s242_s1 + $0x10] sm:$0xff]  ;;  %v193_v16 = vmov 3   ;;  %vm194_vm0 = vmmov 0   ;;  %v195_v21 = vmov 0.0   ;;  %v11_v22 = vlaneseq }
   0x2   :  { %v45_v3 = vld [vmem:[%s242_s1] sm:$0xff]  ;;  %15 = vperm.xlu0 %184, %v13_v1   ;;  %v29_v5 = vadd.s32 32, %v13_v1  ;;  %165 = vmatprep.subr.bf16.mxu0 %v191_v6  ;;  %v48_v9 = vld [vmem:[%s242_s1 + $0x18] sm:$0xff]  ;;  %v21_v10 = vadd.s32 16, %v13_v1  ;;  %v37_v12 = vadd.s32 48, %v13_v1  ;;  %v50_v14 = vld [vmem:[%s242_s1 + $0x28] sm:$0xff] }
   0x3   :  { %v166_v7 = vpack.c.bf16 %v46_v4, %v45_v3  ;;  %v169_v11 = vpack.c.bf16 %v48_v9, %v47_v8  ;;  %v49_v13 = vld [vmem:[%s242_s1 + $0x20] sm:$0xff]  ;;  %v51_v18 = vld [vmem:[%s242_s1 + $0x30] sm:$0xff]  ;;  %v52_v19 = vld [vmem:[%s242_s1 + $0x38] sm:$0xff]  ;;  %162 = vmatprep.mubr.msk.f32.mxu0 %vm194_vm0, %v195_v21  ;;  %v12_v23 = vand.u32 127, %v11_v22  ;;  %vm53_vm5 = vcmask 523264  }
   0x4   :  { %31 = vperm.xlu1 %186, %v29_v5   ;;  %v172_v17 = vpack.c.bf16 %v50_v14, %v49_v13  ;;  %v175_v20 = vpack.c.bf16 %v52_v19, %v51_v18 }
   0x5   :  { %167 = vmatpush3.bf16.msra.mxu0 %v166_v7 }
   0x6   :  { %168 = vmatprep.subr.bf16.mxu0 %v191_v6  ;;  %185 = vset.pattern.permute.xlu0 %v192_v15 }
   0x7   :  { %23 = vperm.xlu0 %185, %v21_v10  }
   0x8   :  { %187 = vset.pattern.permute.xlu1 %v193_v16 }
   0x9   :  { %170 = vmatpush3.bf16.msra.mxu0 %v169_v11  ;;  %39 = vperm.xlu1 %187, %v37_v12  }
   0xa   :  { %171 = vmatprep.subr.bf16.mxu0 %v191_v6 }
   0xb   :  { %188 = vset.pattern.permute.xlu0 %v193_v16 }
   0xd   :  { %173 = vmatpush3.bf16.msra.mxu0 %v172_v17 }
   0xe   :  { %174 = vmatprep.subr.bf16.mxu0 %v191_v6 }
  0x11   :  { %176 = vmatpush3.bf16.msra.mxu0 %v175_v20 }
  0x81   :  { %v16_v24 = vpop.permute.xlu0 %15 }
  0x82   :  { %vm17_vm1 = vcmp.eq.s32.totalorder %v12_v23, %v16_v24 }
  0x83   :  { %v32_v25 = vpop.permute.xlu1 %31  ;;  %v132_v27 = vsel %vm17_vm1, 1.0, %v195_v21 }
  0x84   :  { %vm33_vm2 = vcmp.eq.s32.totalorder %v12_v23, %v32_v25 }
  0x85   :  { %v134_v31 = vsel %vm33_vm2, 1.0, %v195_v21 }
  0x86   :  { %v24_v26 = vpop.permute.xlu0 %23 }
  0x87   :  { %vm25_vm3 = vcmp.eq.s32.totalorder %v12_v23, %v24_v26 }
  0x88   :  { %v133_v28 = vsel %vm25_vm3, 1.0, %v195_v21  ;;  %v40_v29 = vpop.permute.xlu1 %39 }
  0x89   :  { %v28_v30 = vadd.f32 %v133_v28, %v132_v27  ;;  %vm41_vm4 = vcmp.eq.s32.totalorder %v12_v23, %v40_v29 }
  0x8a   :  { %v135_v32 = vsel %vm41_vm4, 1.0, %v195_v21 }
  0x8b   :  { %v36_v33 = vadd.f32 %v134_v31, %v28_v30 }
  0x8d   :  { %v44_v34 = vadd.f32 %v135_v32, %v36_v33 }
  0x8f   :  { %163 = vmatmul.mubr.msk.f32.vlgmr.msra.gmra.mrb[0].mxu0 %vm53_vm5, %v44_v34 }
 0x162   :  { %v123_v35 = vpop.f32.mrb[0].mxu0 }
 0x163   :  { %127 = vst [vmem:[%s243_s2] sm:$0xff] %v123_v35  ;;  %v164_v36 = vpop.f32.mrb[1].mxu0 }

</bundles_post_ra>
